<compile_context>
chip_gen: v6e
topology: v6e:2x2x1
jax: 0.10.0
libtpu: 0.0.40
codegen_flags: <defaults>
</compile_context>

<pallas_src>
import functools

import numpy as np
import jax
import jax.numpy as jnp
from jax import lax
from jax.experimental import pallas as pl
from jax.experimental.pallas import tpu as pltpu


# ----------------------------------------------------------------------------- kernels
def _gemm_bias_kernel(x_ref, w_ref, b_ref, o_ref, *, apply_relu):
    """Fused (TM,K)bf16 @ (K,N)bf16 -> f32 acc, + (1,N) f32 bias (+ReLU), cast on store."""
    acc = jnp.dot(x_ref[...], w_ref[...], preferred_element_type=jnp.float32)
    acc = acc + b_ref[...]
    if apply_relu:
        acc = jnp.maximum(acc, 0.0)
    o_ref[...] = acc.astype(o_ref.dtype)


def _default_tm(M, K, N):
    """Row-tile size: keep double-buffered bf16 input + f32 output blocks under ~6 MiB
    (fits comfortably inside v7x 64 MiB VMEM and v5e's 16 MiB scoped default)."""
    per_row = 2 * (K * 2 + N * 4)                      # 2x buffers (in bf16 + out f32)
    tm = max(256, min(4096, (6 * 1024 * 1024) // per_row))
    tm = (tm // 256) * 256                             # multiple of 8 (sublane) & roomy
    return min(tm, M)


def pallas_gemm_bias(x, w, b, *, apply_relu, out_dtype=jnp.float32, tm=None):
    """x: (M,K), w: (K,N), b: (N,) -> (M,N).  M-tiled, pipelined, bf16 MXU / f32 acc."""
    M, K = x.shape
    K2, N = w.shape
    assert K == K2
    x = x.astype(jnp.bfloat16)
    w = w.astype(jnp.bfloat16)
    b = jnp.reshape(b, (1, N)).astype(jnp.float32)

    if tm is None:
        tm = _default_tm(M, K, N)
    tm = min(tm, M)
    grid_m = pl.cdiv(M, tm)

    cost = pl.CostEstimate(
        flops=2 * M * K * N,
        transcendentals=0,
        bytes_accessed=M * K * 2 + K * N * 2 + N * 4 + M * N * np.dtype(out_dtype).itemsize,
    )
    kernel = functools.partial(_gemm_bias_kernel, apply_relu=apply_relu)
    return pl.pallas_call(
        kernel,
        out_shape=jax.ShapeDtypeStruct((M, N), out_dtype),
        grid=(grid_m,),
        in_specs=[
            pl.BlockSpec((tm, K), lambda i: (i, 0)),   # streamed row tiles (pipelined)
            pl.BlockSpec((K, N), lambda i: (0, 0)),    # weight stays VMEM-resident
            pl.BlockSpec((1, N), lambda i: (0, 0)),    # bias stays VMEM-resident
        ],
        out_specs=pl.BlockSpec((tm, N), lambda i: (i, 0)),
        compiler_params=pltpu.CompilerParams(
            dimension_semantics=("parallel",),         # independent row tiles -> megacore
            vmem_limit_bytes=32 * 1024 * 1024,         # safe on v5e/v6e/v7x
        ),
        cost_estimate=cost,
    )(x, w, b)


# ------------------------------------------------------------------------------- glue
def _im2col(x_nhwc, stride):
    """3x3, pad=1 patch extraction (pure data movement, runs as XLA fusions under jit).

    Returns patches of shape (N*OH*OW, 9*C) with feature order (kh, kw, ci)."""
    N, H, W, C = x_nhwc.shape
    xp = jnp.pad(x_nhwc, ((0, 0), (1, 1), (1, 1), (0, 0)))
    OH = (H + 2 - 3) // stride + 1
    OW = (W + 2 - 3) // stride + 1
    cols = []
    for kh in range(3):
        for kw in range(3):
            sl = lax.slice(
                xp,
                (0, kh, kw, 0),
                (N, kh + stride * (OH - 1) + 1, kw + stride * (OW - 1) + 1, C),
                (1, stride, stride, 1),
            )  # (N, OH, OW, C)
            cols.append(sl)
    patches = jnp.concatenate(cols, axis=-1)  # (N, OH, OW, 9*C)
    return patches.reshape(N * OH * OW, 9 * C), N, OH, OW


def pack_params(params, input_shape):
    """Hoist all weight-layout work out of the forward path (done once)."""
    _, h, w = input_shape
    packed = {}
    for i in range(1, 5):
        wgt, bias = params["conv%d" % i]
        cout = wgt.shape[0]
        # PyTorch conv weight (Cout, Cin, 3, 3) -> GEMM matrix (9*Cin, Cout),
        # row order (kh, kw, ci), matching _im2col's feature order.
        wg = jnp.transpose(wgt, (2, 3, 1, 0)).reshape(-1, cout).astype(jnp.bfloat16)
        packed["conv%d" % i] = (wg, bias.reshape(1, cout).astype(jnp.float32))
    w5, b5 = params["fc"]
    feat = w5.shape[0]
    hf, wf, c_last = h // 8, w // 8, 64
    # nn.Flatten flattens NCHW (c,h,w); permute the fc weight columns to (h,w,c) so the
    # NHWC activation can be flattened with a plain reshape (no activation transpose).
    wg5 = (w5.reshape(feat, c_last, hf, wf)
              .transpose(2, 3, 1, 0)
              .reshape(hf * wf * c_last, feat)
              .astype(jnp.bfloat16))
    packed["fc"] = (wg5, b5.reshape(1, feat).astype(jnp.float32))
    return packed


def st_dim_cnn_forward(x_nchw, packed, fmaps=False):
    """Mirrors ST_DIM_CNN.forward. Input is NCHW (PyTorch convention)."""
    x = jnp.transpose(x_nchw, (0, 2, 3, 1)).astype(jnp.bfloat16)  # -> NHWC, bf16
    f5 = None
    for i, stride in enumerate((2, 2, 2, 1)):
        wg, b = packed["conv%d" % (i + 1)]
        patches, n, oh, ow = _im2col(x, stride)
        y = pallas_gemm_bias(patches, wg, b, apply_relu=True, out_dtype=jnp.bfloat16)
        x = y.reshape(n, oh, ow, wg.shape[1])
        if i == 2:
            f5 = x  # after main[:6]; already NHWC == f5.permute(0, 2, 3, 1)
    wg5, b5 = packed["fc"]
    flat = x.reshape(x.shape[0], -1)            # NHWC flatten; fc weight pre-permuted
    out = pallas_gemm_bias(flat, wg5, b5, apply_relu=False, out_dtype=jnp.float32)
    if fmaps:
        return {"f5": f5.astype(jnp.float32), "out": out}
    return out


# ----------------------------------------------------------------- parameter creation
def _orthogonal(key, shape, gain):
    """Deterministic orthogonal init (mirrors init_orthogonal(module, gain))."""
    rows = shape[0]
    cols = int(np.prod(shape[1:]))
    big, small = max(rows, cols), min(rows, cols)
    a = jax.random.normal(key, (big, small), dtype=jnp.float32)
    q, r = jnp.linalg.qr(a)
    q = q * jnp.sign(jnp.diagonal(r))
    if rows < cols:
        q = q.T
    return (gain * q[:rows, :cols]).reshape(shape).astype(jnp.float32)


def make_params(key, input_shape, feature_dim, gain=0.5):
    c_in, h, w = input_shape
    final_conv_size = 64 * (w // 8) * (h // 8)
    shapes = {
        "conv1": (32, c_in, 3, 3),
        "conv2": (64, 32, 3, 3),
        "conv3": (64, 64, 3, 3),
        "conv4": (64, 64, 3, 3),
        "fc": (feature_dim, final_conv_size),
    }
    params = {}
    for name, shp in shapes.items():
        key, kw_, kb_ = jax.random.split(key, 3)
        wgt = _orthogonal(kw_, shp, gain)
        bias = jax.random.uniform(kb_, (shp[0],), jnp.float32, -0.05, 0.05)
        params[name] = (wgt, bias)
    return params


# --------------------------------------------------------------------- pure-JAX check
def reference_forward(x_nchw, params):
    x = jnp.transpose(x_nchw, (0, 2, 3, 1)).astype(jnp.float32)
    for i, stride in enumerate((2, 2, 2, 1)):
        w, b = params["conv%d" % (i + 1)]
        wh = jnp.transpose(w, (2, 3, 1, 0))  # HWIO
        x = lax.conv_general_dilated(
            x, wh, (stride, stride), ((1, 1), (1, 1)),
            dimension_numbers=("NHWC", "HWIO", "NHWC"))
        x = jnp.maximum(x + b, 0.0)
    w5, b5 = params["fc"]
    flat = jnp.transpose(x, (0, 3, 1, 2)).reshape(x.shape[0], -1)
    return flat @ w5.T + b5


# ------------------------------------------------------------------------------ main
if __name__ == "__main__":
    key = jax.random.PRNGKey(0)
    input_shape = (4, 16, 16)   # (C, H, W); H and W divisible by 8 as the module assumes
    feature_dim = 32
    batch = 2

    kx, kp, k1, k2, k3 = jax.random.split(key, 5)
    x = jax.random.normal(kx, (batch,) + input_shape, dtype=jnp.float32)  # NCHW
    params = make_params(kp, input_shape, feature_dim)
    packed = pack_params(params, input_shape)

    # Full forward (bf16 MXU path) vs f32 XLA-conv reference.
    fwd = jax.jit(lambda xb, pk: st_dim_cnn_forward(xb, pk))
    out = jax.block_until_ready(fwd(x, packed))
    assert out.shape == (batch, feature_dim)
    ref = jax.block_until_ready(reference_forward(x, params))
    # bf16 activations/weights with f32 accumulation -> ~1% relative error budget.
    np.testing.assert_allclose(np.asarray(out), np.asarray(ref), rtol=2e-2, atol=5e-3)

    # Exercise the multi-tile pipelined GEMM path (grid > 1, resident weight block).
    xm = jax.random.normal(k1, (2048, 256), dtype=jnp.float32)
    wm = jax.random.normal(k2, (256, 128), dtype=jnp.float32) / 16.0
    bm = jax.random.normal(k3, (128,), dtype=jnp.float32)
    ym = jax.block_until_ready(
        pallas_gemm_bias(xm, wm, bm, apply_relu=False, tm=512))   # grid = 4
    xb = np.asarray(xm.astype(jnp.bfloat16)).astype(np.float32)
    wb = np.asarray(wm.astype(jnp.bfloat16)).astype(np.float32)
    ref_m = xb @ wb + np.asarray(bm)
    np.testing.assert_allclose(np.asarray(ym), ref_m, rtol=1e-3, atol=1e-3)

    print("KERNEL_OK")
</pallas_src>

<mosaic_0001>
module attributes {stable_mosaic.version = 11 : i64} {
  func.func @_gemm_bias_kernel(%arg0: i32, %arg1: memref<128x36xbf16, #tpu.memory_space<vmem>>, %arg2: memref<36x32xbf16, #tpu.memory_space<vmem>>, %arg3: memref<1x32xf32, #tpu.memory_space<vmem>>, %arg4: memref<128x32xbf16, #tpu.memory_space<vmem>>) attributes {dimension_semantics = [#tpu.dimension_semantics<parallel>], iteration_bounds = array<i64: 1>, scalar_prefetch = 0 : i64, scratch_operands = 0 : i64, tpu.core_type = #tpu.core_type<tc>, window_params = [{transform_indices = @transform_0, window_bounds = array<i64: 128, 36>}, {pipeline_mode = #tpu.pipeline_mode<synchronous>, transform_indices = @transform_1, window_bounds = array<i64: 36, 32>}, {pipeline_mode = #tpu.pipeline_mode<synchronous>, transform_indices = @transform_2, window_bounds = array<i64: 1, 32>}, {transform_indices = @transform_3, window_bounds = array<i64: 128, 32>}]} {
    %c0 = arith.constant 0 : index
    %c0_0 = arith.constant 0 : index
    %0 = vector.load %arg1[%c0, %c0_0] : memref<128x36xbf16, #tpu.memory_space<vmem>>, vector<128x36xbf16>
    %c0_1 = arith.constant 0 : index
    %c0_2 = arith.constant 0 : index
    %1 = vector.load %arg2[%c0_1, %c0_2] : memref<36x32xbf16, #tpu.memory_space<vmem>>, vector<36x32xbf16>
    %cst = arith.constant dense<0.000000e+00> : vector<128x32xf32>
    %2 = tpu.matmul %0, %1, %cst {dimension_numbers = #tpu.dot_dimension_numbers<[1], [0], [0], [1], [0, 0, 1, 1], [], []>} : vector<128x36xbf16>, vector<36x32xbf16>, vector<128x32xf32> -> vector<128x32xf32>
    %c0_3 = arith.constant 0 : index
    %c0_4 = arith.constant 0 : index
    %3 = vector.load %arg3[%c0_3, %c0_4] : memref<1x32xf32, #tpu.memory_space<vmem>>, vector<1x32xf32>
    %4 = vector.broadcast %3 : vector<1x32xf32> to vector<128x32xf32>
    %5 = arith.addf %2, %4 : vector<128x32xf32>
    %cst_5 = arith.constant 0.000000e+00 : f32
    %6 = vector.broadcast %cst_5 : f32 to vector<128x32xf32>
    %7 = arith.maximumf %5, %6 : vector<128x32xf32>
    %8 = arith.truncf %7 : vector<128x32xf32> to vector<128x32xbf16>
    %c0_6 = arith.constant 0 : index
    %c0_7 = arith.constant 0 : index
    %9 = vector.load %arg4[%c0_6, %c0_7] : memref<128x32xbf16, #tpu.memory_space<vmem>>, vector<128x32xbf16>
    tpu.vector_store %arg4[%c0_6, %c0_7], %8 {strides = array<i32>} : memref<128x32xbf16, #tpu.memory_space<vmem>>, vector<128x32xbf16>,
    return
  }
  func.func @transform_0(%arg0: i32) -> (i32, i32) {
    %c0_i32 = arith.constant 0 : i32
    %c0_i32_0 = arith.constant 0 : i32
    return %arg0, %c0_i32 : i32, i32
  }
  func.func @transform_1(%arg0: i32) -> (i32, i32) {
    %c0_i32 = arith.constant 0 : i32
    %c0_i32_0 = arith.constant 0 : i32
    %c0_i32_1 = arith.constant 0 : i32
    return %c0_i32, %c0_i32_0 : i32, i32
  }
  func.func @transform_2(%arg0: i32) -> (i32, i32) {
    %c0_i32 = arith.constant 0 : i32
    %c0_i32_0 = arith.constant 0 : i32
    %c0_i32_1 = arith.constant 0 : i32
    return %c0_i32, %c0_i32_0 : i32, i32
  }
  func.func @transform_3(%arg0: i32) -> (i32, i32) {
    %c0_i32 = arith.constant 0 : i32
    %c0_i32_0 = arith.constant 0 : i32
    return %arg0, %c0_i32 : i32, i32
  }
}

module attributes {stable_mosaic.version = 11 : i64} {
  func.func @_gemm_bias_kernel(%arg0: i32, %arg1: memref<32x288xbf16, #tpu.memory_space<vmem>>, %arg2: memref<288x64xbf16, #tpu.memory_space<vmem>>, %arg3: memref<1x64xf32, #tpu.memory_space<vmem>>, %arg4: memref<32x64xbf16, #tpu.memory_space<vmem>>) attributes {dimension_semantics = [#tpu.dimension_semantics<parallel>], iteration_bounds = array<i64: 1>, scalar_prefetch = 0 : i64, scratch_operands = 0 : i64, tpu.core_type = #tpu.core_type<tc>, window_params = [{transform_indices = @transform_0, window_bounds = array<i64: 32, 288>}, {pipeline_mode = #tpu.pipeline_mode<synchronous>, transform_indices = @transform_1, window_bounds = array<i64: 288, 64>}, {pipeline_mode = #tpu.pipeline_mode<synchronous>, transform_indices = @transform_2, window_bounds = array<i64: 1, 64>}, {transform_indices = @transform_3, window_bounds = array<i64: 32, 64>}]} {
    %c0 = arith.constant 0 : index
    %c0_0 = arith.constant 0 : index
    %0 = vector.load %arg1[%c0, %c0_0] : memref<32x288xbf16, #tpu.memory_space<vmem>>, vector<32x288xbf16>
    %c0_1 = arith.constant 0 : index
    %c0_2 = arith.constant 0 : index
    %1 = vector.load %arg2[%c0_1, %c0_2] : memref<288x64xbf16, #tpu.memory_space<vmem>>, vector<288x64xbf16>
    %cst = arith.constant dense<0.000000e+00> : vector<32x64xf32>
    %2 = tpu.matmul %0, %1, %cst {dimension_numbers = #tpu.dot_dimension_numbers<[1], [0], [0], [1], [0, 0, 1, 1], [], []>} : vector<32x288xbf16>, vector<288x64xbf16>, vector<32x64xf32> -> vector<32x64xf32>
    %c0_3 = arith.constant 0 : index
    %c0_4 = arith.constant 0 : index
    %3 = vector.load %arg3[%c0_3, %c0_4] : memref<1x64xf32, #tpu.memory_space<vmem>>, vector<1x64xf32>
    %4 = vector.broadcast %3 : vector<1x64xf32> to vector<32x64xf32>
    %5 = arith.addf %2, %4 : vector<32x64xf32>
    %cst_5 = arith.constant 0.000000e+00 : f32
    %6 = vector.broadcast %cst_5 : f32 to vector<32x64xf32>
    %7 = arith.maximumf %5, %6 : vector<32x64xf32>
    %8 = arith.truncf %7 : vector<32x64xf32> to vector<32x64xbf16>
    %c0_6 = arith.constant 0 : index
    %c0_7 = arith.constant 0 : index
    %9 = vector.load %arg4[%c0_6, %c0_7] : memref<32x64xbf16, #tpu.memory_space<vmem>>, vector<32x64xbf16>
    tpu.vector_store %arg4[%c0_6, %c0_7], %8 {strides = array<i32>} : memref<32x64xbf16, #tpu.memory_space<vmem>>, vector<32x64xbf16>,
    return
  }
  func.func @transform_0(%arg0: i32) -> (i32, i32) {
    %c0_i32 = arith.constant 0 : i32
    %c0_i32_0 = arith.constant 0 : i32
    return %arg0, %c0_i32 : i32, i32
  }
  func.func @transform_1(%arg0: i32) -> (i32, i32) {
    %c0_i32 = arith.constant 0 : i32
    %c0_i32_0 = arith.constant 0 : i32
    %c0_i32_1 = arith.constant 0 : i32
    return %c0_i32, %c0_i32_0 : i32, i32
  }
  func.func @transform_2(%arg0: i32) -> (i32, i32) {
    %c0_i32 = arith.constant 0 : i32
    %c0_i32_0 = arith.constant 0 : i32
    %c0_i32_1 = arith.constant 0 : i32
    return %c0_i32, %c0_i32_0 : i32, i32
  }
  func.func @transform_3(%arg0: i32) -> (i32, i32) {
    %c0_i32 = arith.constant 0 : i32
    %c0_i32_0 = arith.constant 0 : i32
    return %arg0, %c0_i32 : i32, i32
  }
}

module attributes {stable_mosaic.version = 11 : i64} {
  func.func @_gemm_bias_kernel(%arg0: i32, %arg1: memref<8x576xbf16, #tpu.memory_space<vmem>>, %arg2: memref<576x64xbf16, #tpu.memory_space<vmem>>, %arg3: memref<1x64xf32, #tpu.memory_space<vmem>>, %arg4: memref<8x64xbf16, #tpu.memory_space<vmem>>) attributes {dimension_semantics = [#tpu.dimension_semantics<parallel>], iteration_bounds = array<i64: 1>, scalar_prefetch = 0 : i64, scratch_operands = 0 : i64, tpu.core_type = #tpu.core_type<tc>, window_params = [{transform_indices = @transform_0, window_bounds = array<i64: 8, 576>}, {pipeline_mode = #tpu.pipeline_mode<synchronous>, transform_indices = @transform_1, window_bounds = array<i64: 576, 64>}, {pipeline_mode = #tpu.pipeline_mode<synchronous>, transform_indices = @transform_2, window_bounds = array<i64: 1, 64>}, {transform_indices = @transform_3, window_bounds = array<i64: 8, 64>}]} {
    %c0 = arith.constant 0 : index
    %c0_0 = arith.constant 0 : index
    %0 = vector.load %arg1[%c0, %c0_0] : memref<8x576xbf16, #tpu.memory_space<vmem>>, vector<8x576xbf16>
    %c0_1 = arith.constant 0 : index
    %c0_2 = arith.constant 0 : index
    %1 = vector.load %arg2[%c0_1, %c0_2] : memref<576x64xbf16, #tpu.memory_space<vmem>>, vector<576x64xbf16>
    %cst = arith.constant dense<0.000000e+00> : vector<8x64xf32>
    %2 = tpu.matmul %0, %1, %cst {dimension_numbers = #tpu.dot_dimension_numbers<[1], [0], [0], [1], [0, 0, 1, 1], [], []>} : vector<8x576xbf16>, vector<576x64xbf16>, vector<8x64xf32> -> vector<8x64xf32>
    %c0_3 = arith.constant 0 : index
    %c0_4 = arith.constant 0 : index
    %3 = vector.load %arg3[%c0_3, %c0_4] : memref<1x64xf32, #tpu.memory_space<vmem>>, vector<1x64xf32>
    %4 = vector.broadcast %3 : vector<1x64xf32> to vector<8x64xf32>
    %5 = arith.addf %2, %4 : vector<8x64xf32>
    %cst_5 = arith.constant 0.000000e+00 : f32
    %6 = vector.broadcast %cst_5 : f32 to vector<8x64xf32>
    %7 = arith.maximumf %5, %6 : vector<8x64xf32>
    %8 = arith.truncf %7 : vector<8x64xf32> to vector<8x64xbf16>
    %c0_6 = arith.constant 0 : index
    %c0_7 = arith.constant 0 : index
    %9 = vector.load %arg4[%c0_6, %c0_7] : memref<8x64xbf16, #tpu.memory_space<vmem>>, vector<8x64xbf16>
    tpu.vector_store %arg4[%c0_6, %c0_7], %8 {strides = array<i32>} : memref<8x64xbf16, #tpu.memory_space<vmem>>, vector<8x64xbf16>,
    return
  }
  func.func @transform_0(%arg0: i32) -> (i32, i32) {
    %c0_i32 = arith.constant 0 : i32
    %c0_i32_0 = arith.constant 0 : i32
    return %arg0, %c0_i32 : i32, i32
  }
  func.func @transform_1(%arg0: i32) -> (i32, i32) {
    %c0_i32 = arith.constant 0 : i32
    %c0_i32_0 = arith.constant 0 : i32
    %c0_i32_1 = arith.constant 0 : i32
    return %c0_i32, %c0_i32_0 : i32, i32
  }
  func.func @transform_2(%arg0: i32) -> (i32, i32) {
    %c0_i32 = arith.constant 0 : i32
    %c0_i32_0 = arith.constant 0 : i32
    %c0_i32_1 = arith.constant 0 : i32
    return %c0_i32, %c0_i32_0 : i32, i32
  }
  func.func @transform_3(%arg0: i32) -> (i32, i32) {
    %c0_i32 = arith.constant 0 : i32
    %c0_i32_0 = arith.constant 0 : i32
    return %arg0, %c0_i32 : i32, i32
  }
}

module attributes {stable_mosaic.version = 11 : i64} {
  func.func @_gemm_bias_kernel(%arg0: i32, %arg1: memref<2x256xbf16, #tpu.memory_space<vmem>>, %arg2: memref<256x32xbf16, #tpu.memory_space<vmem>>, %arg3: memref<1x32xf32, #tpu.memory_space<vmem>>, %arg4: memref<2x32xf32, #tpu.memory_space<vmem>>) attributes {dimension_semantics = [#tpu.dimension_semantics<parallel>], iteration_bounds = array<i64: 1>, scalar_prefetch = 0 : i64, scratch_operands = 0 : i64, tpu.core_type = #tpu.core_type<tc>, window_params = [{transform_indices = @transform_0, window_bounds = array<i64: 2, 256>}, {pipeline_mode = #tpu.pipeline_mode<synchronous>, transform_indices = @transform_1, window_bounds = array<i64: 256, 32>}, {pipeline_mode = #tpu.pipeline_mode<synchronous>, transform_indices = @transform_2, window_bounds = array<i64: 1, 32>}, {transform_indices = @transform_3, window_bounds = array<i64: 2, 32>}]} {
    %c0 = arith.constant 0 : index
    %c0_0 = arith.constant 0 : index
    %0 = vector.load %arg1[%c0, %c0_0] : memref<2x256xbf16, #tpu.memory_space<vmem>>, vector<2x256xbf16>
    %c0_1 = arith.constant 0 : index
    %c0_2 = arith.constant 0 : index
    %1 = vector.load %arg2[%c0_1, %c0_2] : memref<256x32xbf16, #tpu.memory_space<vmem>>, vector<256x32xbf16>
    %cst = arith.constant dense<0.000000e+00> : vector<2x32xf32>
    %2 = tpu.matmul %0, %1, %cst {dimension_numbers = #tpu.dot_dimension_numbers<[1], [0], [0], [1], [0, 0, 1, 1], [], []>} : vector<2x256xbf16>, vector<256x32xbf16>, vector<2x32xf32> -> vector<2x32xf32>
    %c0_3 = arith.constant 0 : index
    %c0_4 = arith.constant 0 : index
    %3 = vector.load %arg3[%c0_3, %c0_4] : memref<1x32xf32, #tpu.memory_space<vmem>>, vector<1x32xf32>
    %4 = vector.broadcast %3 : vector<1x32xf32> to vector<2x32xf32>
    %5 = arith.addf %2, %4 : vector<2x32xf32>
    %c0_5 = arith.constant 0 : index
    %c0_6 = arith.constant 0 : index
    %6 = vector.load %arg4[%c0_5, %c0_6] : memref<2x32xf32, #tpu.memory_space<vmem>>, vector<2x32xf32>
    tpu.vector_store %arg4[%c0_5, %c0_6], %5 {strides = array<i32>} : memref<2x32xf32, #tpu.memory_space<vmem>>, vector<2x32xf32>,
    return
  }
  func.func @transform_0(%arg0: i32) -> (i32, i32) {
    %c0_i32 = arith.constant 0 : i32
    %c0_i32_0 = arith.constant 0 : i32
    return %arg0, %c0_i32 : i32, i32
  }
  func.func @transform_1(%arg0: i32) -> (i32, i32) {
    %c0_i32 = arith.constant 0 : i32
    %c0_i32_0 = arith.constant 0 : i32
    %c0_i32_1 = arith.constant 0 : i32
    return %c0_i32, %c0_i32_0 : i32, i32
  }
  func.func @transform_2(%arg0: i32) -> (i32, i32) {
    %c0_i32 = arith.constant 0 : i32
    %c0_i32_0 = arith.constant 0 : i32
    %c0_i32_1 = arith.constant 0 : i32
    return %c0_i32, %c0_i32_0 : i32, i32
  }
  func.func @transform_3(%arg0: i32) -> (i32, i32) {
    %c0_i32 = arith.constant 0 : i32
    %c0_i32_0 = arith.constant 0 : i32
    return %arg0, %c0_i32 : i32, i32
  }
}

</mosaic_0001>

<bundles_post_ra>
// kernel: _lambda_.5
= control target key start
LH: loop header
LB: loop body
LE: loop exit
PB: predicated region body
PF: predicated region fallthrough
CT: control target
= control target key end

     0   :  { %vm123_vm0 = vcmask 1041408   ;;  %vm98_vm1 = vcmask 293888   ;;  %vm304_vm2 = vcmask 257024   ;;  %s575_s1 = inlined_call_operand.vmem [shape: bf16[36,32], index: 1, kind: input, shape index: {}]   ;;  %s576_s0 = inlined_call_operand.vmem [shape: bf16[128,36], index: 0, kind: input, shape index: {}]   ;;  %s577_s2 = inlined_call_operand.vmem [shape: f32[1,32], index: 2, kind: input, shape index: {}]   ;;  %s578_s3 = inlined_call_operand.vmem [shape: bf16[128,32], index: 3, kind: output, shape index: {}]  }
   0x1   :  { %v418_v0 = vld [vmem:[%s575_s1 + $0x10] ss:$0 sps:$4 sm:$0x33]   ;;  %v419_v1 = vld [vmem:[%s575_s1 + $0x8] sm:$0xff]   ;;  %v420_v3 = vld [vmem:[%s575_s1] sm:$0xff]  }
   0x2   :  { %416 = vmatprep.subr.msk.bf16.mxu0 %vm123_vm0, %v418_v0  ;;  %417 = vmatprep.subr.msk.bf16.mxu1 %vm123_vm0, %v418_v0  ;;  %v125_v2 = vsel %vm123_vm0, %v418_v0, 0  ;;  %v421_v4 = vld [vmem:[%s576_s0] sm:$0xff]   ;;  %v423_v6 = vld [vmem:[%s576_s0 + $0x8] sm:$0xff]   ;;  %v425_v8 = vld [vmem:[%s576_s0 + $0x10] sm:$0xff]  }
   0x3   :  { %389 = vmatpush3.bf16.msra.mxu0 %v125_v2  ;;  %413 = vmatpush3.bf16.msra.mxu1 %v125_v2  ;;  %v422_v5 = vld [vmem:[%s576_s0 + $0x20] sm:$0xff]   ;;  %v424_v7 = vld [vmem:[%s576_s0 + $0x28] sm:$0xff]   ;;  %v426_v9 = vld [vmem:[%s576_s0 + $0x30] sm:$0xff]  }
   0x4   :  { %390 = vmatprep.subr.bf16.mxu0 %v419_v1  ;;  %411 = vmatprep.subr.bf16.mxu1 %v419_v1  ;;  %v427_v10 = vld [vmem:[%s576_s0 + $0x18] sm:$0xff]   ;;  %v493_v12 = vld [vmem:[%s577_s2] ss:$0 sm:$0xff] }
   0x5   :  { %394 = vmatprep.mubr.msk.bf16.mxu0 %vm98_vm1, %v421_v4  ;;  %402 = vmatprep.mubr.msk.bf16.mxu1 %vm98_vm1, %v422_v5  ;;  %v428_v11 = vld [vmem:[%s576_s0 + $0x38] sm:$0xff]  }
   0x7   :  { %391 = vmatpush3.bf16.msra.mxu0 %v419_v1  ;;  %414 = vmatpush3.bf16.msra.mxu1 %v419_v1 }
   0x8   :  { %392 = vmatprep.subr.bf16.mxu0 %v420_v3  ;;  %412 = vmatprep.subr.bf16.mxu1 %v420_v3 }
   0xb   :  { %393 = vmatpush3.bf16.msra.mxu0 %v420_v3  ;;  %415 = vmatpush3.bf16.msra.mxu1 %v420_v3 }
   0xe   :  { %395 = vmatmul.mubr.msk.bf16.vlgmr.msra.gmra.mxu0 %vm98_vm1, %v423_v6  ;;  %403 = vmatmul.mubr.msk.bf16.vlgmr.msra.gmra.mxu1 %vm98_vm1, %v424_v7 }
   0xf   :  { %398 = vmatprep.mubr.msk.bf16.mxu0 %vm98_vm1, %v425_v8  ;;  %406 = vmatprep.mubr.msk.bf16.mxu1 %vm98_vm1, %v426_v9 }
  0x16   :  { %399 = vmatmul.mubr.msk.bf16.gmra.mxu0 %vm98_vm1, %v427_v10  ;;  %407 = vmatmul.mubr.msk.bf16.gmra.mxu1 %vm98_vm1, %v428_v11 }
  0xce   :  { %v396_v13 = vpop.f32.mrf.mxu0  ;;  %v404_v14 = vpop.f32.mrf.mxu1 }
  0xcf   :  { %v170_v15 = vadd.f32 %v396_v13, %v493_v12  ;;  %v202_v16 = vadd.f32 %v404_v14, %v493_v12 }
  0xd0   :  { %v161_v17 = vpop.f32.mrf.mxu0  ;;  %v193_v18 = vpop.f32.mrf.mxu1 }
  0xd1   :  { %v226_v19 = vmax.f32 %v170_v15, 0.0  ;;  %v234_v20 = vmax.f32 %v202_v16, 0.0  ;;  %v162_v21 = vadd.f32 %v493_v12, %v161_v17  ;;  %v194_v22 = vadd.f32 %v493_v12, %v193_v18 }
  0xd2   :  { %v397_v23 = vpop.f32.mrf.mxu0  ;;  %v405_v24 = vpop.f32.mrf.mxu1 }
  0xd3   :  { %v363_v25 = vpack.c.bf16 %v226_v19, %v226_v19  ;;  %v371_v26 = vpack.c.bf16 %v234_v20, %v234_v20  ;;  %v224_v27 = vmax.f32 %v162_v21, 0.0  ;;  %v232_v28 = vmax.f32 %v194_v22, 0.0 }
  0xd4   :  { %v173_v29 = vadd.f32 %v397_v23, %v493_v12  ;;  %v205_v30 = vadd.f32 %v405_v24, %v493_v12  ;;  %v164_v31 = vpop.f32.mrf.mxu0  ;;  %v196_v32 = vpop.f32.mrf.mxu1 }
  0xd5   :  { %307 = vst.msk [vmem:[%s578_s3 + $0x8] sm:$0xf] %vm304_vm2, %v363_v25  ;;  %315 = vst.msk [vmem:[%s578_s3 + $0x28] sm:$0xf] %vm304_vm2, %v371_v26  ;;  %v361_v33 = vpack.c.bf16 %v224_v27, %v224_v27  ;;  %v369_v34 = vpack.c.bf16 %v232_v28, %v232_v28  ;;  %v165_v35 = vadd.f32 %v493_v12, %v164_v31 }
  0xd6   :  { %v197_v36 = vadd.f32 %v493_v12, %v196_v32  ;;  %v227_v37 = vmax.f32 %v173_v29, 0.0  ;;  %v235_v38 = vmax.f32 %v205_v30, 0.0  ;;  %v400_v39 = vpop.f32.mrf.mxu0  ;;  %v408_v40 = vpop.f32.mrf.mxu1 }
  0xd7   :  { %305 = vst.msk [vmem:[%s578_s3] sm:$0xf] %vm304_vm2, %v361_v33  ;;  %313 = vst.msk [vmem:[%s578_s3 + $0x20] sm:$0xf] %vm304_vm2, %v369_v34  ;;  %v225_v41 = vmax.f32 %v165_v35, 0.0  ;;  %v186_v43 = vadd.f32 %v400_v39, %v493_v12  ;;  %v218_v44 = vadd.f32 %v408_v40, %v493_v12 }
  0xd8   :  { %v233_v42 = vmax.f32 %v197_v36, 0.0  ;;  %v364_v45 = vpack.c.bf16 %v227_v37, %v227_v37  ;;  %v372_v46 = vpack.c.bf16 %v235_v38, %v235_v38  ;;  %v177_v47 = vpop.f32.mrf.mxu0  ;;  %v209_v48 = vpop.f32.mrf.mxu1 }
  0xd9   :  { %v362_v49 = vpack.c.bf16 %v225_v41, %v225_v41  ;;  %v230_v51 = vmax.f32 %v186_v43, 0.0  ;;  %v238_v52 = vmax.f32 %v218_v44, 0.0  ;;  %v178_v53 = vadd.f32 %v493_v12, %v177_v47 }
  0xda   :  { %v370_v50 = vpack.c.bf16 %v233_v42, %v233_v42  ;;  %308 = vst.msk [vmem:[%s578_s3 + $0xc] sm:$0xf] %vm304_vm2, %v364_v45  ;;  %316 = vst.msk [vmem:[%s578_s3 + $0x2c] sm:$0xf] %vm304_vm2, %v372_v46  ;;  %v210_v54 = vadd.f32 %v493_v12, %v209_v48  ;;  %v401_v55 = vpop.f32.mrf.mxu0  ;;  %v409_v56 = vpop.f32.mrf.mxu1 }
  0xdb   :  { %306 = vst.msk [vmem:[%s578_s3 + $0x4] sm:$0xf] %vm304_vm2, %v362_v49  ;;  %v367_v57 = vpack.c.bf16 %v230_v51, %v230_v51  ;;  %v375_v58 = vpack.c.bf16 %v238_v52, %v238_v52  ;;  %v189_v59 = vadd.f32 %v401_v55, %v493_v12  ;;  %v221_v60 = vadd.f32 %v409_v56, %v493_v12 }
  0xdc   :  { %314 = vst.msk [vmem:[%s578_s3 + $0x24] sm:$0xf] %vm304_vm2, %v370_v50  ;;  %v228_v61 = vmax.f32 %v178_v53, 0.0  ;;  %v236_v62 = vmax.f32 %v210_v54, 0.0  ;;  %v180_v63 = vpop.f32.mrf.mxu0  ;;  %v212_v0 = vpop.f32.mrf.mxu1 }
  0xdd   :  { %311 = vst.msk [vmem:[%s578_s3 + $0x18] sm:$0xf] %vm304_vm2, %v367_v57  ;;  %319 = vst.msk [vmem:[%s578_s3 + $0x38] sm:$0xf] %vm304_vm2, %v375_v58  ;;  %v231_v1 = vmax.f32 %v189_v59, 0.0  ;;  %v239_v2 = vmax.f32 %v221_v60, 0.0  ;;  %v181_v3 = vadd.f32 %v493_v12, %v180_v63  ;;  %v213_v4 = vadd.f32 %v493_v12, %v212_v0 }
  0xde   :  { %v365_v5 = vpack.c.bf16 %v228_v61, %v228_v61  ;;  %v373_v6 = vpack.c.bf16 %v236_v62, %v236_v62 }
  0xdf   :  { %v368_v7 = vpack.c.bf16 %v231_v1, %v231_v1  ;;  %v376_v8 = vpack.c.bf16 %v239_v2, %v239_v2  ;;  %v229_v9 = vmax.f32 %v181_v3, 0.0  ;;  %v237_v10 = vmax.f32 %v213_v4, 0.0 }
  0xe0   :  { %309 = vst.msk [vmem:[%s578_s3 + $0x10] sm:$0xf] %vm304_vm2, %v365_v5  ;;  %317 = vst.msk [vmem:[%s578_s3 + $0x30] sm:$0xf] %vm304_vm2, %v373_v6 }
  0xe1   :  { %312 = vst.msk [vmem:[%s578_s3 + $0x1c] sm:$0xf] %vm304_vm2, %v368_v7  ;;  %320 = vst.msk [vmem:[%s578_s3 + $0x3c] sm:$0xf] %vm304_vm2, %v376_v8  ;;  %v366_v11 = vpack.c.bf16 %v229_v9, %v229_v9  ;;  %v374_v12 = vpack.c.bf16 %v237_v10, %v237_v10 }
  0xe3   :  { %310 = vst.msk [vmem:[%s578_s3 + $0x14] sm:$0xf] %vm304_vm2, %v366_v11  ;;  %318 = vst.msk [vmem:[%s578_s3 + $0x34] sm:$0xf] %vm304_vm2, %v374_v12 }

// kernel: _lambda_.6
= control target key start
LH: loop header
LB: loop body
LE: loop exit
PB: predicated region body
PF: predicated region fallthrough
CT: control target
= control target key end

     0   :  { %vm204_vm0 = vcmask 261120   ;;  %vm329_vm1 = vcmask 519168   ;;  %s550_s1 = inlined_call_operand.vmem [shape: bf16[288,64], index: 1, kind: input, shape index: {}]   ;;  %s551_s0 = inlined_call_operand.vmem [shape: bf16[32,288], index: 0, kind: input, shape index: {}]   ;;  %s552_s2 = inlined_call_operand.vmem [shape: f32[1,64], index: 2, kind: input, shape index: {}]   ;;  %s553_s3 = inlined_call_operand.vmem [shape: bf16[32,64], index: 3, kind: output, shape index: {}]  }
   0x1   :  { %v413_v0 = vld [vmem:[%s550_s1 + $0x78] sm:$0xff]   ;;  %v415_v2 = vld [vmem:[%s550_s1 + $0x70] sm:$0xff]   ;;  %v417_v4 = vld [vmem:[%s550_s1 + $0x68] sm:$0xff]  }
   0x2   :  { %v414_v1 = vld [vmem:[%s550_s1 + $0x38] sm:$0xff]   ;;  %373 = vmatprep.subr.bf16.mxu0 %v413_v0  ;;  %v416_v3 = vld [vmem:[%s550_s1 + $0x30] sm:$0xff]   ;;  %v418_v5 = vld [vmem:[%s550_s1 + $0x28] sm:$0xff]  }
   0x3   :  { %374 = vmatpush3.bf16.msra.mxu0 %v414_v1  ;;  %v419_v6 = vld [vmem:[%s550_s1 + $0x60] sm:$0xff]   ;;  %v421_v8 = vld [vmem:[%s550_s1 + $0x58] sm:$0xff]   ;;  %v428_v10 = vld [vmem:[%s550_s1 + $0x88] sm:$0xff]  }
   0x4   :  { %375 = vmatprep.subr.bf16.mxu0 %v415_v2  ;;  %v420_v7 = vld [vmem:[%s550_s1 + $0x20] sm:$0xff]   ;;  %v422_v9 = vld [vmem:[%s550_s1 + $0x18] sm:$0xff]   ;;  %v423_v11 = vld [vmem:[%s550_s1 + $0x50] sm:$0xff]   ;;  %405 = vmatprep.subr.bf16.mxu1 %v428_v10 }
   0x5   :  { %v424_v12 = vld [vmem:[%s550_s1 + $0x10] sm:$0xff]   ;;  %v425_v13 = vld [vmem:[%s550_s1 + $0x48] sm:$0xff]   ;;  %406 = vmatpush3.bf16.msra.mxu1 %v428_v10  ;;  %v433_v15 = vld [vmem:[%s550_s1 + $0x80] sm:$0xff]  }
   0x6   :  { %v432_v14 = vld [vmem:[%s551_s0 + $0x4] ss:$12 sps:$4 sm:$0xff]   ;;  %v434_v16 = vld [vmem:[%s551_s0 + $0x8] ss:$12 sps:$4 sm:$0xff]   ;;  %407 = vmatprep.subr.bf16.mxu1 %v433_v15  ;;  %v435_v17 = vld [vmem:[%s551_s0 + $0x20] ss:$12 sps:$4 sm:$0xff]  }
   0x7   :  { %376 = vmatpush3.bf16.msra.mxu0 %v416_v3  ;;  %243 = vmatprep.mubr.bf16.mxu0 %v432_v14  ;;  %v426_v18 = vld [vmem:[%s550_s1 + $0x8] sm:$0xff]   ;;  %v427_v19 = vld [vmem:[%s550_s1 + $0x40] sm:$0xff]  }
   0x8   :  { %377 = vmatprep.subr.bf16.mxu0 %v417_v4  ;;  %409 = vmatprep.mubr.msk.bf16.mxu1 %vm204_vm0, %v434_v16  ;;  %v429_v20 = vld [vmem:[%s550_s1] sm:$0xff]   ;;  %v436_v22 = vld [vmem:[%s551_s0 + $0x1c] ss:$12 sps:$4 sm:$0xff]  }
   0x9   :  { %408 = vmatpush3.bf16.msra.mxu1 %v433_v15  ;;  %v430_v21 = vld [vmem:[%s551_s0] ss:$12 sps:$4 sm:$0xff]   ;;  %v438_v23 = vld [vmem:[%s551_s0 + $0x18] ss:$12 sps:$4 sm:$0xff]  }
   0xa   :  { %v338_v28 = vld [vmem:[%s552_s2] ss:$0 sm:$0xff] }
   0xb   :  { %378 = vmatpush3.bf16.msra.mxu0 %v418_v5 }
   0xc   :  { %379 = vmatprep.subr.bf16.mxu0 %v419_v6  ;;  %410 = vmatmul.mubr.msk.bf16.vlgmr.msra.gmra.mxu1 %vm204_vm0, %v435_v17 }
   0xf   :  { %380 = vmatpush3.bf16.msra.mxu0 %v420_v7 }
  0x10   :  { %381 = vmatprep.subr.bf16.mxu0 %v421_v8 }
  0x13   :  { %382 = vmatpush3.bf16.msra.mxu0 %v422_v9 }
  0x14   :  { %383 = vmatprep.subr.bf16.mxu0 %v423_v11 }
  0x17   :  { %384 = vmatpush3.bf16.msra.mxu0 %v424_v12 }
  0x18   :  { %385 = vmatprep.subr.bf16.mxu0 %v425_v13 }
  0x1b   :  { %386 = vmatpush3.bf16.msra.mxu0 %v426_v18 }
  0x1c   :  { %387 = vmatprep.subr.bf16.mxu0 %v427_v19 }
  0x1f   :  { %388 = vmatpush3.bf16.msra.mxu0 %v429_v20 }
  0x22   :  { %244 = vmatmul.mubr.bf16.vlgmr.msra.gmra.mxu0 %v430_v21 }
  0x23   :  { %251 = vmatprep.mubr.bf16.mxu0 %v436_v22 }
  0x2a   :  { %252 = vmatmul.mubr.bf16.gmra.mxu0 %v438_v23 }
  0xcc   :  { %v411_v24 = vpop.f32.mrf.mxu1 }
  0xce   :  { %v294_v26 = vpop.f32.mrf.mxu1 }
  0xd0   :  { %v412_v31 = vpop.f32.mrf.mxu1 }
  0xd2   :  { %v297_v37 = vpop.f32.mrf.mxu1 }
  0xe2   :  { %v389_v25 = vpop.f32.mrf.mxu0 }
  0xe4   :  { %v390_v27 = vpop.f32.mrf.mxu0 }
  0xe5   :  { %v391_v29 = vadd.f32 %v390_v27, %v389_v25 }
  0xe6   :  { %v392_v30 = vpop.f32.mrf.mxu0 }
  0xe7   :  { %v246_v32 = vadd.f32 %v391_v29, %v338_v28 }
  0xe8   :  { %v393_v33 = vpop.f32.mrf.mxu0 }
  0xe9   :  { %v394_v34 = vadd.f32 %v393_v33, %v392_v30  ;;  %v295_v35 = vadd.f32 %v294_v26, %v246_v32 }
  0xea   :  { %v395_v36 = vpop.f32.mrf.mxu0 }
  0xeb   :  { %v309_v38 = vmax.f32 %v295_v35, 0.0  ;;  %v249_v39 = vadd.f32 %v394_v34, %v338_v28 }
  0xec   :  { %v396_v40 = vpop.f32.mrf.mxu0 }
  0xed   :  { %v369_v41 = vpack.c.bf16 %v309_v38, %v309_v38  ;;  %v397_v42 = vadd.f32 %v396_v40, %v395_v36  ;;  %v298_v43 = vadd.f32 %v297_v37, %v249_v39 }
  0xee   :  { %v398_v44 = vpop.f32.mrf.mxu0 }
  0xef   :  { %330 = vst.msk [vmem:[%s553_s3] sm:$0xf] %vm329_vm1, %v369_v41  ;;  %v254_v45 = vadd.f32 %v397_v42, %v338_v28  ;;  %v310_v46 = vmax.f32 %v298_v43, 0.0 }
  0xf0   :  { %v399_v47 = vpop.f32.mrf.mxu0 }
  0xf1   :  { %v303_v48 = vadd.f32 %v411_v24, %v254_v45  ;;  %v370_v49 = vpack.c.bf16 %v310_v46, %v310_v46  ;;  %v400_v50 = vadd.f32 %v399_v47, %v398_v44 }
  0xf3   :  { %v311_v51 = vmax.f32 %v303_v48, 0.0  ;;  %331 = vst.msk [vmem:[%s553_s3 + $0x4] sm:$0xf] %vm329_vm1, %v370_v49  ;;  %v257_v52 = vadd.f32 %v400_v50, %v338_v28 }
  0xf5   :  { %v371_v53 = vpack.c.bf16 %v311_v51, %v311_v51  ;;  %v306_v54 = vadd.f32 %v412_v31, %v257_v52 }
  0xf7   :  { %332 = vst.msk [vmem:[%s553_s3 + $0x8] sm:$0xf] %vm329_vm1, %v371_v53  ;;  %v312_v55 = vmax.f32 %v306_v54, 0.0 }
  0xf9   :  { %v372_v56 = vpack.c.bf16 %v312_v55, %v312_v55 }
  0xfb   :  { %333 = vst.msk [vmem:[%s553_s3 + $0xc] sm:$0xf] %vm329_vm1, %v372_v56 }

// kernel: _lambda_.9
= control target key start
LH: loop header
LB: loop body
LE: loop exit
PB: predicated region body
PF: predicated region fallthrough
CT: control target
= control target key end

     0   :  { %v68_v9 = vlaneseq  ;;  %v313_v13 = vmov 1966171168   ;;  %s392_s0 = inlined_call_operand.vmem [shape: bf16[2,256], index: 0, kind: input, shape index: {}]   ;;  %s393_s1 = inlined_call_operand.vmem [shape: bf16[256,32], index: 1, kind: input, shape index: {}]   ;;  %s394_s2 = inlined_call_operand.vmem [shape: f32[1,32], index: 2, kind: input, shape index: {}]   ;;  %s395_s3 = inlined_call_operand.hbm [shape: f32[2,32], index: 3, kind: output, shape index: {}]  }
   0x1   :  { %v275_v0 = vld [vmem:[%s393_s1 + $0x78] sm:$0xff]   ;;  %v277_v2 = vld [vmem:[%s393_s1 + $0x70] sm:$0xff]   ;;  %v279_v4 = vld [vmem:[%s393_s1 + $0x68] sm:$0xff]   ;;  %v66_v14 = vunpack.c.l.s4 %v313_v13 }
   0x2   :  { %v276_v1 = vld [vmem:[%s393_s1 + $0x38] sm:$0xff]   ;;  %251 = vmatprep.subr.bf16.mxu0 %v275_v0  ;;  %v278_v3 = vld [vmem:[%s393_s1 + $0x30] sm:$0xff]   ;;  %v280_v5 = vld [vmem:[%s393_s1 + $0x28] sm:$0xff]   ;;  %v69_v15 = vshrl.u32 %v68_v9, 7 }
   0x3   :  { %252 = vmatpush3.bf16.msra.mxu0 %v276_v1  ;;  %v281_v6 = vld [vmem:[%s393_s1 + $0x60] sm:$0xff]   ;;  %v283_v8 = vld [vmem:[%s393_s1 + $0x58] sm:$0xff]   ;;  %v285_v11 = vld [vmem:[%s393_s1 + $0x50] sm:$0xff]  }
   0x4   :  { %253 = vmatprep.subr.bf16.mxu0 %v277_v2  ;;  %v282_v7 = vld [vmem:[%s393_s1 + $0x20] sm:$0xff]   ;;  %v284_v10 = vld [vmem:[%s393_s1 + $0x18] sm:$0xff]  }
   0x5   :  { %v234_v12 = vld.sshfl [vmem:[%s392_s0] sm:$0x11 pattern:$0x75316420] }
   0x7   :  { %254 = vmatpush3.bf16.msra.mxu0 %v278_v3 }
   0x8   :  { %255 = vmatprep.subr.bf16.mxu0 %v279_v4 }
   0xb   :  { %256 = vmatpush3.bf16.msra.mxu0 %v280_v5 }
   0xc   :  { %257 = vmatprep.subr.bf16.mxu0 %v281_v6 }
   0xf   :  { %258 = vmatpush3.bf16.msra.mxu0 %v282_v7 }
  0x10   :  { %259 = vmatprep.subr.bf16.mxu0 %v283_v8 }
  0x11   :  { %8 = vsyncpa [#allocation3], 0  ;;  %v286_v16 = vld [vmem:[%s393_s1 + $0x10] sm:$0xff]   ;;  %v64_v17 = vcombine.high %v234_v12, %v234_v12  ;;  %v67_v18 = vunpack.c.0.s8 %v66_v14  ;;  %v287_v19 = vld [vmem:[%s393_s1 + $0x48] sm:$0xff]   ;;  %s314_s20 = smov [#allocation2]   ;;  %vm217_vm0 = vcmask 254976  }
  0x12   :  { %v288_v21 = vld [vmem:[%s393_s1 + $0x8] sm:$0xff]   ;;  %v289_v23 = vld [vmem:[%s393_s1 + $0x40] sm:$0xff]   ;;  %s225_s21 = sshll.u32 %s314_s20, 4  ;;  %s226_s21 = int_to_ptr.vmem [resolvable:$true] %s225_s21 }
  0x13   :  { %260 = vmatpush3.bf16.msra.mxu0 %v284_v10  ;;  %v70_v20 = vsub.s32 %v67_v18, %v69_v15  ;;  %v290_v24 = vld [vmem:[%s393_s1] sm:$0xff]   ;;  %s291_s1 = scalar_lea.vmem %s226_s21, 32  ;;  %p296_p1 = scmp.lt.s32.totalorder %s226_s21, %s226_s21 }
  0x14   :  { %261 = vmatprep.subr.bf16.mxu0 %v285_v11  ;;  %v233_v27 = vld [vmem:[%s394_s2] ss:$0 sm:$0xff]  ;;  %p292_p0 = scmp.ne.s32.totalorder %s226_s21, %s291_s1  ;;  %p297_p2 = scmp.lt.s32.totalorder %s291_s1, %s291_s1 }
  0x15   :  { %v78_v22 = vrot.slane %v64_v17, %v70_v20  ;;  %v71_v25 = vrot.slane %v234_v12, %v70_v20 }
  0x16   :  { %p298_p3 = por %p297_p2, %p296_p1 }
  0x17   :  { %262 = vmatpush3.bf16.msra.mxu0 %v286_v16  ;;  %209 = vmatprep.mubr.bf16.mxu0 %v78_v22 }
  0x18   :  { %263 = vmatprep.subr.bf16.mxu0 %v287_v19  ;;  %p299_p4 = pnand %p298_p3, %p292_p0 }
  0x1b   :  { %264 = vmatpush3.bf16.msra.mxu0 %v288_v21 }
  0x1c   :  { %265 = vmatprep.subr.bf16.mxu0 %v289_v23 }
  0x1f   :  { %266 = vmatpush3.bf16.msra.mxu0 %v290_v24 }
  0x22   :  { %210 = vmatmul.mubr.bf16.vlgmr.msra.gmra.mxu0 %v71_v25 }
  0xe2   :  { %v267_v26 = vpop.f32.mrf.mxu0 }
  0xe4   :  { %v268_v28 = vpop.f32.mrf.mxu0 }
  0xe5   :  { %v269_v29 = vadd.f32 %v268_v28, %v267_v26 }
  0xe6   :  { %v270_v30 = vpop.f32.mrf.mxu0 }
  0xe7   :  { %v212_v31 = vadd.f32 %v269_v29, %v233_v27 }
  0xe8   :  { %v271_v32 = vpop.f32.mrf.mxu0 }
  0xe9   :  { %218 = vst.msk [vmem:[#allocation2] sm:$0x3] %vm217_vm0, %v212_v31 }
  0xea   :  { %302 = shalt.err (!%p299_p4)
}
  0xeb   :  { %228 = dma.vmem_to_hbm [thread:$0]  %s226_s21, 32, %s395_s3, [#allocation3]  }
  0xec   :  { %311 = dma.done.wait [#allocation3], 32  }
  0xed   :  { %312 = vsyncadd [#allocation3], 4294967264 }
  0xee   :  { %232 = vsyncpa [#allocation3], 1 }

// kernel: _lambda_.7
= control target key start
LH: loop header
LB: loop body
LE: loop exit
PB: predicated region body
PF: predicated region fallthrough
CT: control target
= control target key end

     0   :  { %v609_v35 = vmov 0.0   ;;  %vm610_vm0 = vmmov 0   ;;  %vm330_vm1 = vcmask 523264   ;;  %vm456_vm2 = vcmask 519168   ;;  %s754_s1 = inlined_call_operand.vmem [shape: bf16[576,64], index: 1, kind: input, shape index: {}]   ;;  %s755_s0 = inlined_call_operand.vmem [shape: bf16[8,576], index: 0, kind: input, shape index: {}]   ;;  %s756_s2 = inlined_call_operand.vmem [shape: f32[1,64], index: 2, kind: input, shape index: {}]   ;;  %s757_s3 = inlined_call_operand.vmem [shape: bf16[8,64], index: 3, kind: output, shape index: {}]  }
   0x1   :  { %v568_v0 = vld [vmem:[%s754_s1 + $0x78] sm:$0xff]   ;;  %v572_v4 = vld [vmem:[%s754_s1 + $0x70] sm:$0xff]   ;;  %v576_v8 = vld [vmem:[%s754_s1 + $0x68] sm:$0xff]  }
   0x2   :  { %v569_v1 = vld [vmem:[%s754_s1 + $0x38] sm:$0xff]   ;;  %505 = vmatprep.subr.bf16.mxu0 %v568_v0  ;;  %v573_v5 = vld [vmem:[%s754_s1 + $0x30] sm:$0xff]   ;;  %v577_v9 = vld [vmem:[%s754_s1 + $0x28] sm:$0xff]  }
   0x3   :  { %v570_v2 = vld [vmem:[%s754_s1 + $0xf8] sm:$0xff]   ;;  %506 = vmatpush3.bf16.msra.mxu0 %v569_v1  ;;  %v574_v6 = vld [vmem:[%s754_s1 + $0xf0] sm:$0xff]   ;;  %v578_v10 = vld [vmem:[%s754_s1 + $0xe8] sm:$0xff]  }
   0x4   :  { %v571_v3 = vld [vmem:[%s754_s1 + $0xb8] sm:$0xff]   ;;  %527 = vmatprep.subr.bf16.mxu1 %v570_v2  ;;  %507 = vmatprep.subr.bf16.mxu0 %v572_v4  ;;  %v575_v7 = vld [vmem:[%s754_s1 + $0xb0] sm:$0xff]   ;;  %v579_v11 = vld [vmem:[%s754_s1 + $0xa8] sm:$0xff]  }
   0x5   :  { %528 = vmatpush3.bf16.msra.mxu1 %v571_v3  ;;  %v580_v12 = vld [vmem:[%s754_s1 + $0x60] sm:$0xff]   ;;  %v584_v16 = vld [vmem:[%s754_s1 + $0x58] sm:$0xff]   ;;  %v588_v20 = vld [vmem:[%s754_s1 + $0x50] sm:$0xff]  }
   0x6   :  { %529 = vmatprep.subr.bf16.mxu1 %v574_v6  ;;  %v581_v13 = vld [vmem:[%s754_s1 + $0x20] sm:$0xff]   ;;  %v585_v17 = vld [vmem:[%s754_s1 + $0x18] sm:$0xff]   ;;  %v589_v21 = vld [vmem:[%s754_s1 + $0x10] sm:$0xff]  }
   0x7   :  { %508 = vmatpush3.bf16.msra.mxu0 %v573_v5  ;;  %v582_v14 = vld [vmem:[%s754_s1 + $0xe0] sm:$0xff]   ;;  %v586_v18 = vld [vmem:[%s754_s1 + $0xd8] sm:$0xff]   ;;  %v590_v22 = vld [vmem:[%s754_s1 + $0xd0] sm:$0xff]  }
   0x8   :  { %509 = vmatprep.subr.bf16.mxu0 %v576_v8  ;;  %v583_v15 = vld [vmem:[%s754_s1 + $0xa0] sm:$0xff]   ;;  %v587_v19 = vld [vmem:[%s754_s1 + $0x98] sm:$0xff]   ;;  %v591_v23 = vld [vmem:[%s754_s1 + $0x90] sm:$0xff]  }
   0x9   :  { %530 = vmatpush3.bf16.msra.mxu1 %v575_v7  ;;  %v592_v24 = vld [vmem:[%s754_s1 + $0x48] sm:$0xff]   ;;  %v596_v28 = vld [vmem:[%s754_s1 + $0x40] sm:$0xff]   ;;  %v605_v39 = vld [vmem:[%s754_s1 + $0x118] sm:$0xff]  }
   0xa   :  { %531 = vmatprep.subr.bf16.mxu1 %v578_v10  ;;  %v593_v25 = vld [vmem:[%s754_s1 + $0x8] sm:$0xff]   ;;  %v597_v29 = vld [vmem:[%s754_s1] sm:$0xff]   ;;  %v606_v40 = vld [vmem:[%s754_s1 + $0x110] sm:$0xff]  }
   0xb   :  { %510 = vmatpush3.bf16.msra.mxu0 %v577_v9  ;;  %v594_v26 = vld [vmem:[%s754_s1 + $0xc8] sm:$0xff]   ;;  %v598_v30 = vld [vmem:[%s754_s1 + $0xc0] sm:$0xff]   ;;  %v601_v43 = vld [vmem:[%s755_s0 + $0x10] ss:$0 sps:$4 sm:$0xff]  }
   0xc   :  { %511 = vmatprep.subr.bf16.mxu0 %v580_v12  ;;  %v595_v27 = vld [vmem:[%s754_s1 + $0x88] sm:$0xff]   ;;  %v15_v31 = vld [vmem:[%s755_s0] sm:$0xff] }
   0xd   :  { %532 = vmatpush3.bf16.msra.mxu1 %v579_v11  ;;  %v463_v32 = vcombine.low %v15_v31, %v15_v31  ;;  %v464_v33 = vcombine.high %v15_v31, %v15_v31  ;;  %v602_v34 = vld [vmem:[%s754_s1 + $0x80] sm:$0xff]   ;;  %v16_v36 = vld [vmem:[%s755_s0 + $0x8] sm:$0xff] }
   0xe   :  { %533 = vmatprep.subr.bf16.mxu1 %v582_v14  ;;  %v465_v37 = vcombine.low %v16_v36, %v16_v36  ;;  %v466_v38 = vcombine.high %v16_v36, %v16_v36  ;;  %v607_v41 = vld [vmem:[%s754_s1 + $0x108] sm:$0xff]   ;;  %v608_v42 = vld [vmem:[%s754_s1 + $0x100] sm:$0xff]  }
   0xf   :  { %512 = vmatpush3.bf16.msra.mxu0 %v581_v13  ;;  %366 = vmatprep.mubr.bf16.mxu0 %v464_v33  ;;  %v462_v52 = vld [vmem:[%s756_s2] ss:$0 sm:$0xff] }
  0x10   :  { %513 = vmatprep.subr.bf16.mxu0 %v584_v16  ;;  %406 = vmatprep.mubr.bf16.mxu1 %v466_v38 }
  0x11   :  { %534 = vmatpush3.bf16.msra.mxu1 %v583_v15 }
  0x12   :  { %535 = vmatprep.subr.bf16.mxu1 %v586_v18 }
  0x13   :  { %514 = vmatpush3.bf16.msra.mxu0 %v585_v17 }
  0x14   :  { %515 = vmatprep.subr.bf16.mxu0 %v588_v20 }
  0x15   :  { %536 = vmatpush3.bf16.msra.mxu1 %v587_v19 }
  0x16   :  { %537 = vmatprep.subr.bf16.mxu1 %v590_v22 }
  0x17   :  { %516 = vmatpush3.bf16.msra.mxu0 %v589_v21 }
  0x18   :  { %517 = vmatprep.subr.bf16.mxu0 %v592_v24 }
  0x19   :  { %538 = vmatpush3.bf16.msra.mxu1 %v591_v23 }
  0x1a   :  { %539 = vmatprep.subr.bf16.mxu1 %v594_v26 }
  0x1b   :  { %518 = vmatpush3.bf16.msra.mxu0 %v593_v25 }
  0x1c   :  { %519 = vmatprep.subr.bf16.mxu0 %v596_v28 }
  0x1d   :  { %540 = vmatpush3.bf16.msra.mxu1 %v595_v27 }
  0x1e   :  { %541 = vmatprep.subr.bf16.mxu1 %v598_v30 }
  0x1f   :  { %520 = vmatpush3.bf16.msra.mxu0 %v597_v29 }
  0x20   :  { %554 = vmatprep.subr.bf16.mxu0 %v609_v35 }
  0x21   :  { %542 = vmatpush3.bf16.msra.mxu1 %v602_v34 }
  0x22   :  { %367 = vmatmul.mubr.bf16.vlgmr.msra.gmra.mxu0 %v463_v32 }
  0x23   :  { %555 = vmatpush3.bf16.msra.mxu0 %v605_v39  ;;  %562 = vmatprep.mubr.msk.bf16.mxu0 %vm610_vm0, %v609_v35 }
  0x24   :  { %407 = vmatmul.mubr.bf16.vlgmr.msra.gmra.mxu1 %v465_v37  ;;  %556 = vmatprep.subr.bf16.mxu0 %v609_v35 }
  0x27   :  { %557 = vmatpush3.bf16.msra.mxu0 %v606_v40 }
  0x28   :  { %558 = vmatprep.subr.bf16.mxu0 %v609_v35 }
  0x2b   :  { %559 = vmatpush3.bf16.msra.mxu0 %v607_v41 }
  0x2c   :  { %560 = vmatprep.subr.bf16.mxu0 %v609_v35 }
  0x2f   :  { %561 = vmatpush3.bf16.msra.mxu0 %v608_v42 }
  0x32   :  { %563 = vmatmul.mubr.msk.bf16.vlgmr.msra.gmra.mxu0 %vm330_vm1, %v601_v43 }
  0xe2   :  { %v521_v44 = vpop.f32.mrf.mxu0 }
  0xe4   :  { %v522_v45 = vpop.f32.mrf.mxu0  ;;  %v543_v46 = vpop.f32.mrf.mxu1 }
  0xe5   :  { %v523_v51 = vadd.f32 %v522_v45, %v521_v44 }
  0xe6   :  { %v524_v47 = vpop.f32.mrf.mxu0  ;;  %v544_v48 = vpop.f32.mrf.mxu1 }
  0xe7   :  { %v369_v54 = vadd.f32 %v523_v51, %v462_v52  ;;  %v545_v55 = vadd.f32 %v544_v48, %v543_v46 }
  0xe8   :  { %v525_v49 = vpop.f32.mrf.mxu0  ;;  %v546_v50 = vpop.f32.mrf.mxu1 }
  0xe9   :  { %v409_v56 = vadd.f32 %v545_v55, %v369_v54 }
  0xea   :  { %v547_v53 = vpop.f32.mrf.mxu1 }
  0xf2   :  { %v448_v57 = vpop.f32.mrf.mxu0 }
  0xf3   :  { %v449_v58 = vadd.f32 %v448_v57, %v409_v56 }
  0xf4   :  { %v564_v59 = vpop.f32.mrf.mxu0 }
  0xf5   :  { %v454_v60 = vmax.f32 %v449_v58, 0.0 }
  0xf6   :  { %v451_v61 = vpop.f32.mrf.mxu0 }
  0xf7   :  { %v455_v62 = vpack.c.bf16 %v454_v60, %v454_v60 }
  0xf8   :  { %v565_v63 = vpop.f32.mrf.mxu0 }
  0xf9   :  { %457 = vst.msk [vmem:[%s757_s3] sm:$0xf] %vm456_vm2, %v455_v62 }

</bundles_post_ra>
